<compile_context>
chip_gen: v5e
topology: v5e:2x2
jax: 0.10.0
libtpu: 0.0.40
codegen_flags: <defaults>
</compile_context>

<pallas_src>
import functools

import jax
import jax.numpy as jnp
from jax.experimental import pallas as pl
from jax.experimental.pallas import tpu as pltpu

IP_DIM = 512 * 7 * 7   # 25088
OP_DIM = 4
OP_PAD = 128           # lane-dense output width (zero-padded from 4)


def _bbox_delta_kernel(x_ref, w_ref, b_ref, o_ref, *, tk, precision):
    k = pl.program_id(1)

    # Fold the bias into the accumulator init on the first K step.
    @pl.when(k == 0)
    def _():
        o_ref[...] = jnp.broadcast_to(b_ref[...], o_ref.shape)

    # W is fully resident in VMEM; take the aligned K-slice for this step.
    kk = pl.multiple_of(k * tk, tk)
    o_ref[...] += jnp.dot(
        x_ref[...],
        w_ref[pl.ds(kk, tk), :],
        preferred_element_type=jnp.float32,
        precision=precision,
    )


def prepare_bbox_delta_params(weight, bias, dtype=jnp.bfloat16):
    """One-time parameter prep (call at model init, NOT per forward).

    weight: (4, 25088) torch Linear layout; bias: (4,).
    Returns (w_padded (25088, 128) in `dtype`, bias_padded (1, 128) f32).
    """
    w = jnp.pad(weight.T.astype(dtype), ((0, 0), (0, OP_PAD - OP_DIM)))
    b = jnp.pad(bias.astype(jnp.float32).reshape(1, OP_DIM),
                ((0, 0), (0, OP_PAD - OP_DIM)))
    return w, b


@functools.partial(jax.jit, static_argnames=("tm", "tk"))
def bbox_delta_fc(feature_rois, w_padded, bias_padded, *, tm=512, tk=3584):
    """feature_rois: (b, roi, 512, 7, 7) -> (b, roi, 4) float32."""
    b_size, roi_cnt = feature_rois.shape[0], feature_rois.shape[1]
    m = b_size * roi_cnt
    k_dim = IP_DIM
    assert feature_rois.shape[2:] == (512, 7, 7)
    assert w_padded.shape == (k_dim, OP_PAD) and bias_padded.shape == (1, OP_PAD)
    assert k_dim % tk == 0 and tk % 128 == 0 and tm % 8 == 0

    # Flatten exactly like torch's .view(b, roi, -1); no dtype cast here —
    # the kernel streams X in its incoming dtype (bf16 recommended).
    # TODO(synk): have the upstream ROI-align emit bf16 activations directly;
    # a wrapper-side f32->bf16 cast would add a full extra HBM pass over X.
    x = feature_rois.reshape(m, k_dim)
    assert x.dtype in (jnp.bfloat16, jnp.float32)
    assert x.dtype == w_padded.dtype, "prepare params with the activation dtype"
    # f32 fallback gets exact-ish MXU passes (essentially free: MXU is <5% busy).
    precision = (jax.lax.Precision.HIGHEST if x.dtype == jnp.float32
                 else jax.lax.Precision.DEFAULT)

    # M tile: keep >= 2 M tiles whenever possible so the "parallel" axis can
    # split across both TensorCores on v7x.  No host-side row padding; Pallas
    # handles the ragged last block (its junk rows are never stored to HBM).
    m8 = ((m + 7) // 8) * 8
    half = ((-(-m8 // 2) + 7) // 8) * 8
    tm_eff = max(8, min(tm, half))
    grid = (pl.cdiv(m, tm_eff), k_dim // tk)

    kernel = functools.partial(_bbox_delta_kernel, tk=tk, precision=precision)
    out = pl.pallas_call(
        kernel,
        out_shape=jax.ShapeDtypeStruct((m, OP_PAD), jnp.float32),
        grid_spec=pltpu.PrefetchScalarGridSpec(
            num_scalar_prefetch=0,
            grid=grid,
            in_specs=[
                # X tile, streamed per (i, k) step.  (Optional sweep:
                # pipeline_mode=pl.Buffered(3) — keep only if it measures a win.)
                pl.BlockSpec((tm_eff, tk), lambda i, k: (i, k)),
                # Full-K weight, constant block index -> fetched from HBM once
                # and kept resident in VMEM for the whole call.
                pl.BlockSpec((k_dim, OP_PAD), lambda i, k: (0, 0)),
                # Bias, resident.
                pl.BlockSpec((1, OP_PAD), lambda i, k: (0, 0)),
            ],
            out_specs=pl.BlockSpec((tm_eff, OP_PAD), lambda i, k: (i, 0)),
        ),
        compiler_params=pltpu.CompilerParams(
            dimension_semantics=("parallel", "arbitrary"),
            # Working set (bf16, tm=512, tk=3584): ~7.3 MB X (2 bufs) +
            # ~12.9 MB W (2 bufs) + ~0.5 MB acc.  48 MiB leaves headroom under
            # v7x's 64 MiB physical VMEM and is far below v5e/v6e's 128 MiB.
            vmem_limit_bytes=48 << 20,
        ),
    )(x, w_padded, bias_padded)

    return out[:, :OP_DIM].reshape(b_size, roi_cnt, OP_DIM)


if __name__ == "__main__":
    key = jax.random.PRNGKey(0)
    k_x, k_w, k_b = jax.random.split(key, 3)

    # Small-but-faithful shapes: batch=2, roi_cnt=3, VGG16 ROI feature (512,7,7).
    b_size, roi_cnt = 2, 3
    feature_rois_f32 = jax.random.normal(
        k_x, (b_size, roi_cnt, 512, 7, 7), dtype=jnp.float32
    )
    # Simulate the upstream ROI-align emitting bf16 activations (see TODO).
    feature_rois = feature_rois_f32.astype(jnp.bfloat16)

    # Deterministic synthetic Linear(25088 -> 4) parameters.
    bound = 1.0 / (IP_DIM ** 0.5)
    weight = jax.random.uniform(
        k_w, (OP_DIM, IP_DIM), minval=-bound, maxval=bound, dtype=jnp.float32
    )
    bias = jax.random.uniform(
        k_b, (OP_DIM,), minval=-bound, maxval=bound, dtype=jnp.float32
    )

    # One-time weight prep, hoisted out of the per-call path.
    w_padded, bias_padded = prepare_bbox_delta_params(
        weight, bias, dtype=feature_rois.dtype
    )

    out = bbox_delta_fc(feature_rois, w_padded, bias_padded)
    out = jax.block_until_ready(out)

    # Reference: f32 Linear over the same bf16-rounded activations / weights
    # (matches the kernel's bf16-in / f32-accumulate numerics).
    x_ref = feature_rois.astype(jnp.float32).reshape(b_size * roi_cnt, IP_DIM)
    w_ref = weight.astype(jnp.bfloat16).astype(jnp.float32)
    ref = (x_ref @ w_ref.T + bias).reshape(b_size, roi_cnt, OP_DIM)

    assert out.shape == (b_size, roi_cnt, OP_DIM)
    assert out.dtype == jnp.float32
    assert jnp.allclose(out, ref, atol=2e-3, rtol=2e-3)

    print("KERNEL_OK")
</pallas_src>

<mosaic_0001>
module attributes {stable_mosaic.version = 11 : i64} {
  func.func @_bbox_delta_kernel(%arg0: i32, %arg1: i32, %arg2: memref<8x3584xbf16, #tpu.memory_space<vmem>>, %arg3: memref<25088x128xbf16, #tpu.memory_space<vmem>>, %arg4: memref<1x128xf32, #tpu.memory_space<vmem>>, %arg5: memref<8x128xf32, #tpu.memory_space<vmem>>) attributes {dimension_semantics = [#tpu.dimension_semantics<parallel>, #tpu.dimension_semantics<arbitrary>], iteration_bounds = array<i64: 1, 7>, scalar_prefetch = 0 : i64, scratch_operands = 0 : i64, tpu.core_type = #tpu.core_type<tc>, window_params = [{transform_indices = @transform_0, window_bounds = array<i64: 8, 3584>}, {pipeline_mode = #tpu.pipeline_mode<synchronous>, transform_indices = @transform_1, window_bounds = array<i64: 25088, 128>}, {pipeline_mode = #tpu.pipeline_mode<synchronous>, transform_indices = @transform_2, window_bounds = array<i64: 1, 128>}, {transform_indices = @transform_3, window_bounds = array<i64: 8, 128>}]} {
    %c0_i32 = arith.constant 0 : i32
    %0 = arith.cmpi eq, %arg1, %c0_i32 : i32
    %1 = arith.extui %0 : i1 to i32
    %c0_i32_0 = arith.constant 0 : i32
    %2 = arith.cmpi ne, %1, %c0_i32_0 : i32
    scf.if %2 {
      %c0_7 = arith.constant 0 : index
      %c0_8 = arith.constant 0 : index
      %12 = vector.load %arg4[%c0_7, %c0_8] : memref<1x128xf32, #tpu.memory_space<vmem>>, vector<1x128xf32>
      %13 = vector.shape_cast %12 : vector<1x128xf32> to vector<1x128xf32>
      %14 = vector.broadcast %13 : vector<1x128xf32> to vector<8x128xf32>
      %c0_9 = arith.constant 0 : index
      %c0_10 = arith.constant 0 : index
      %15 = vector.load %arg5[%c0_9, %c0_10] : memref<8x128xf32, #tpu.memory_space<vmem>>, vector<8x128xf32>
      tpu.vector_store %arg5[%c0_9, %c0_10], %14 {strides = array<i32>} : memref<8x128xf32, #tpu.memory_space<vmem>>, vector<8x128xf32>,
    } else {
    }
    %c3584_i32 = arith.constant 3584 : i32
    %3 = arith.muli %arg1, %c3584_i32 : i32
    %4 = tpu.assume_multiple %3, 3584 : i32
    %c0 = arith.constant 0 : index
    %c0_1 = arith.constant 0 : index
    %5 = vector.load %arg5[%c0, %c0_1] : memref<8x128xf32, #tpu.memory_space<vmem>>, vector<8x128xf32>
    %c0_2 = arith.constant 0 : index
    %c0_3 = arith.constant 0 : index
    %6 = vector.load %arg2[%c0_2, %c0_3] : memref<8x3584xbf16, #tpu.memory_space<vmem>>, vector<8x3584xbf16>
    %7 = arith.index_cast %4 : i32 to index
    %c0_4 = arith.constant 0 : index
    %8 = vector.load %arg3[%7, %c0_4] : memref<25088x128xbf16, #tpu.memory_space<vmem>>, vector<3584x128xbf16>
    %cst = arith.constant dense<0.000000e+00> : vector<8x128xf32>
    %9 = tpu.matmul %6, %8, %cst {dimension_numbers = #tpu.dot_dimension_numbers<[1], [0], [0], [1], [0, 0, 1, 1], [], []>} : vector<8x3584xbf16>, vector<3584x128xbf16>, vector<8x128xf32> -> vector<8x128xf32>
    %10 = arith.addf %5, %9 : vector<8x128xf32>
    %c0_5 = arith.constant 0 : index
    %c0_6 = arith.constant 0 : index
    %11 = vector.load %arg5[%c0_5, %c0_6] : memref<8x128xf32, #tpu.memory_space<vmem>>, vector<8x128xf32>
    tpu.vector_store %arg5[%c0_5, %c0_6], %10 {strides = array<i32>} : memref<8x128xf32, #tpu.memory_space<vmem>>, vector<8x128xf32>,
    return
  }
  func.func @transform_0(%arg0: i32, %arg1: i32) -> (i32, i32) {
    %c0_i32 = arith.constant 0 : i32
    return %arg0, %arg1 : i32, i32
  }
  func.func @transform_1(%arg0: i32, %arg1: i32) -> (i32, i32) {
    %c0_i32 = arith.constant 0 : i32
    %c0_i32_0 = arith.constant 0 : i32
    %c0_i32_1 = arith.constant 0 : i32
    return %c0_i32, %c0_i32_0 : i32, i32
  }
  func.func @transform_2(%arg0: i32, %arg1: i32) -> (i32, i32) {
    %c0_i32 = arith.constant 0 : i32
    %c0_i32_0 = arith.constant 0 : i32
    %c0_i32_1 = arith.constant 0 : i32
    return %c0_i32, %c0_i32_0 : i32, i32
  }
  func.func @transform_3(%arg0: i32, %arg1: i32) -> (i32, i32) {
    %c0_i32 = arith.constant 0 : i32
    %c0_i32_0 = arith.constant 0 : i32
    return %arg0, %c0_i32 : i32, i32
  }
}

</mosaic_0001>

<bundles_post_ra>
// kernel: bbox_delta_fc.1
= control target key start
LH: loop header
LB: loop body
LE: loop exit
PB: predicated region body
PF: predicated region fallthrough
CT: control target
= control target key end

     0   :  { %s3748_s12 = smov 0   ;;  %s3750_s13 = smov 0   ;;  %s4038_s0 = inlined_call_operand.vmem [shape: bf16[6,25088], index: 0, kind: input, shape index: {}]   ;;  %s4039_s1 = inlined_call_operand.vmem [shape: bf16[25088,128], index: 1, kind: input, shape index: {}]   ;;  %s4040_s2 = inlined_call_operand.vmem [shape: f32[1,128], index: 2, kind: input, shape index: {}]   ;;  %s4041_s3 = inlined_call_operand.vmem [shape: f32[6,128], index: 3, kind: output, shape index: {}]  }
   0x1   :  { %s3752_s14 = smov 0  }
   0x2 LB: > { %s22_s15 = sadd.s32 1, %s3722_s13  ;;  %p2552_p0 = scmp.ge.s32.totalorder %s3726_s14, 1  ;;  %s3726_s14 = sphi %s3752_s14, %s13_s14   ;;  %s3722_s13 = sphi %s3750_s13, %s4043_s13   ;;  %s3718_s12 = sphi %s3748_s12, %s4042_s12  }
   0x3   : > { %p23_p1 = scmp.ge.s32.totalorder %s22_s15, 7  ;;  %p156_p2 = scmp.lt.s32.totalorder %s3726_s14, 8 }
   0x5   : > { %s4045_s15 = smov (%p23_p1, %s22_s15), 0  ;;  %p157_p3 = pnand %p2552_p0, %p156_p2 }
   0x6   : > { %s183_s16 = smul.u32 (!%p157_p3), 28, %s3718_s12  ;;  %p2554_p5 = scmp.ne.s32.totalorder (!%p157_p3), %s3718_s12, 0 }
   0x7   : > { %160 = sbr.rel (%p157_p3) target bundleno = 391 (0x187), region = 32 }
   0x8   : > { %p186_p4 = scmp.lt.s32.totalorder (!%p157_p3), %s183_s16, 195 }
   0xc   : > { %s4047_s16 = smov (!%p186_p4, %s183_s16), 195  ;;  %200 = sbr.rel (%p2554_p5) target bundleno = 19 (0x13), region = 36 }
   0xd   : > { %s2553_s17 = sshll.u32 %s4047_s16, 2 }
   0xe   : > { %s3769_s20 = scalar_lea.vmem %s4038_s0, %s2553_s17 }
  0x11   : > { %v3703_v0 = vld [vmem:[%s4040_s2] ss:$0 sm:$0xff] }
  0x12   : > { %205 = vst [vmem:[%s4041_s3] sm:$0xff] %v3703_v0 }
  0x13 PF: > { %s206_s25 = smul.u32 3584, %s3718_s12  ;;  %v209_v29 = vld [vmem:[%s3769_s20 + $0x8] sm:$0xff]  ;;  %v208_v30 = vld [vmem:[%s3769_s20] sm:$0xff] }
  0x14   : > { %v690_v33 = vunpack.c.l.b16 %v209_v29  ;;  %v688_v34 = vunpack.c.l.b16 %v208_v30  ;;  %v691_v37 = vunpack.c.h.b16 %v209_v29  ;;  %v689_v38 = vunpack.c.h.b16 %v208_v30 }
  0x15   : > { %s222_s26 = sshra.s32 %s206_s25, 3 }
  0x16   : > { %s2555_s27 = sshll.u32 %s222_s26, 2  ;;  %v718_v43 = vpack.c.b16 %v690_v33, %v690_v33  ;;  %v716_v44 = vpack.c.b16 %v688_v34, %v688_v34  ;;  %v719_v45 = vpack.c.b16 %v691_v37, %v691_v37  ;;  %v717_v46 = vpack.c.b16 %v689_v38, %v689_v38 }
  0x17   : > { %s3780_s30 = scalar_lea.vmem %s4039_s1, %s2555_s27 }
  0x18   : > { %v3462_v1 = vld [vmem:[%s3780_s30 + $0x38] sm:$0xff]  ;;  %v3461_v5 = vld [vmem:[%s3780_s30 + $0x30] sm:$0xff]  ;;  %v3460_v9 = vld [vmem:[%s3780_s30 + $0x28] sm:$0xff] }
  0x19   : > { %v3470_v2 = vld [vmem:[%s3780_s30 + $0x78] sm:$0xff]  ;;  %2116 = vmatpush.bf16.msra.mxu0 %v3462_v1  ;;  %v3469_v6 = vld [vmem:[%s3780_s30 + $0x70] sm:$0xff]  ;;  %v3468_v10 = vld [vmem:[%s3780_s30 + $0x68] sm:$0xff] }
  0x1a   : > { %v3478_v3 = vld [vmem:[%s3780_s30 + $0xb8] sm:$0xff]  ;;  %2129 = vmatpush.bf16.msra.mxu1 %v3470_v2  ;;  %v3477_v7 = vld [vmem:[%s3780_s30 + $0xb0] sm:$0xff]  ;;  %v3476_v11 = vld [vmem:[%s3780_s30 + $0xa8] sm:$0xff] }
  0x1b   : > { %v3486_v4 = vld [vmem:[%s3780_s30 + $0xf8] sm:$0xff]  ;;  %2142 = vmatpush.bf16.msra.mxu2 %v3478_v3  ;;  %v3485_v8 = vld [vmem:[%s3780_s30 + $0xf0] sm:$0xff]  ;;  %v3484_v12 = vld [vmem:[%s3780_s30 + $0xe8] sm:$0xff] }
  0x1c   : > { %2155 = vmatpush.bf16.msra.mxu3 %v3486_v4  ;;  %v3459_v13 = vld [vmem:[%s3780_s30 + $0x20] sm:$0xff]  ;;  %v3458_v17 = vld [vmem:[%s3780_s30 + $0x18] sm:$0xff]  ;;  %v3457_v21 = vld [vmem:[%s3780_s30 + $0x10] sm:$0xff] }
  0x1d   : > { %2117 = vmatpush.bf16.msra.mxu0 %v3461_v5  ;;  %v3467_v14 = vld [vmem:[%s3780_s30 + $0x60] sm:$0xff]  ;;  %v3466_v18 = vld [vmem:[%s3780_s30 + $0x58] sm:$0xff]  ;;  %v3465_v22 = vld [vmem:[%s3780_s30 + $0x50] sm:$0xff] }
  0x1e   : > { %2130 = vmatpush.bf16.msra.mxu1 %v3469_v6  ;;  %v3475_v15 = vld [vmem:[%s3780_s30 + $0xa0] sm:$0xff]  ;;  %v3474_v19 = vld [vmem:[%s3780_s30 + $0x98] sm:$0xff]  ;;  %v3473_v23 = vld [vmem:[%s3780_s30 + $0x90] sm:$0xff] }
  0x1f   : > { %2143 = vmatpush.bf16.msra.mxu2 %v3477_v7  ;;  %v3483_v16 = vld [vmem:[%s3780_s30 + $0xe0] sm:$0xff]  ;;  %v3482_v20 = vld [vmem:[%s3780_s30 + $0xd8] sm:$0xff]  ;;  %v3481_v24 = vld [vmem:[%s3780_s30 + $0xd0] sm:$0xff] }
  0x20   : > { %2156 = vmatpush.bf16.msra.mxu3 %v3485_v8  ;;  %v3456_v25 = vld [vmem:[%s3780_s30 + $0x8] sm:$0xff]  ;;  %v3455_v31 = vld [vmem:[%s3780_s30] sm:$0xff]  ;;  %v3494_v39 = vld [vmem:[%s3780_s30 + $0x138] sm:$0xff] }
  0x21   : > { %2118 = vmatpush.bf16.msra.mxu0 %v3460_v9  ;;  %v3464_v26 = vld [vmem:[%s3780_s30 + $0x48] sm:$0xff]  ;;  %v3463_v32 = vld [vmem:[%s3780_s30 + $0x40] sm:$0xff]  ;;  %v3502_v40 = vld [vmem:[%s3780_s30 + $0x178] sm:$0xff] }
  0x22   : > { %2131 = vmatpush.bf16.msra.mxu1 %v3468_v10  ;;  %v3472_v27 = vld [vmem:[%s3780_s30 + $0x88] sm:$0xff]  ;;  %v3471_v35 = vld [vmem:[%s3780_s30 + $0x80] sm:$0xff]  ;;  %v3510_v41 = vld [vmem:[%s3780_s30 + $0x1b8] sm:$0xff] }
  0x23   : > { %2144 = vmatpush.bf16.msra.mxu2 %v3476_v11  ;;  %v3480_v28 = vld [vmem:[%s3780_s30 + $0xc8] sm:$0xff]  ;;  %v3479_v36 = vld [vmem:[%s3780_s30 + $0xc0] sm:$0xff]  ;;  %v3518_v42 = vld [vmem:[%s3780_s30 + $0x1f8] sm:$0xff] }
  0x24   : > { %2157 = vmatpush.bf16.msra.mxu3 %v3484_v12  ;;  %v3493_v47 = vld [vmem:[%s3780_s30 + $0x130] sm:$0xff]  ;;  %v3492_v51 = vld [vmem:[%s3780_s30 + $0x128] sm:$0xff]  ;;  %v3491_v55 = vld [vmem:[%s3780_s30 + $0x120] sm:$0xff] }
  0x25   : > { %2119 = vmatpush.bf16.msra.mxu0 %v3459_v13  ;;  %v3501_v48 = vld [vmem:[%s3780_s30 + $0x170] sm:$0xff]  ;;  %v3500_v52 = vld [vmem:[%s3780_s30 + $0x168] sm:$0xff]  ;;  %v3499_v56 = vld [vmem:[%s3780_s30 + $0x160] sm:$0xff] }
  0x26   : > { %2132 = vmatpush.bf16.msra.mxu1 %v3467_v14  ;;  %v3509_v49 = vld [vmem:[%s3780_s30 + $0x1b0] sm:$0xff]  ;;  %v3508_v53 = vld [vmem:[%s3780_s30 + $0x1a8] sm:$0xff]  ;;  %v3507_v57 = vld [vmem:[%s3780_s30 + $0x1a0] sm:$0xff] }
  0x27   : > { %2145 = vmatpush.bf16.msra.mxu2 %v3475_v15  ;;  %v3517_v50 = vld [vmem:[%s3780_s30 + $0x1f0] sm:$0xff]  ;;  %v3516_v54 = vld [vmem:[%s3780_s30 + $0x1e8] sm:$0xff]  ;;  %v3515_v58 = vld [vmem:[%s3780_s30 + $0x1e0] sm:$0xff] }
  0x28   : > { %2158 = vmatpush.bf16.msra.mxu3 %v3483_v16  ;;  %v3490_v59 = vld [vmem:[%s3780_s30 + $0x118] sm:$0xff]  ;;  %v3489_v63 = vld [vmem:[%s3780_s30 + $0x110] sm:$0xff]  ;;  %v3488_v3 = vld [vmem:[%s3780_s30 + $0x108] sm:$0xff] }
  0x29   : > { %2120 = vmatpush.bf16.msra.mxu0 %v3458_v17  ;;  %v3498_v60 = vld [vmem:[%s3780_s30 + $0x158] sm:$0xff]  ;;  %v3497_v0 = vld [vmem:[%s3780_s30 + $0x150] sm:$0xff]  ;;  %v3496_v4 = vld [vmem:[%s3780_s30 + $0x148] sm:$0xff] }
  0x2a   : > { %2133 = vmatpush.bf16.msra.mxu1 %v3466_v18  ;;  %v3506_v61 = vld [vmem:[%s3780_s30 + $0x198] sm:$0xff]  ;;  %v3505_v1 = vld [vmem:[%s3780_s30 + $0x190] sm:$0xff]  ;;  %v3504_v5 = vld [vmem:[%s3780_s30 + $0x188] sm:$0xff] }
  0x2b   : > { %2146 = vmatpush.bf16.msra.mxu2 %v3474_v19  ;;  %v3514_v62 = vld [vmem:[%s3780_s30 + $0x1d8] sm:$0xff]  ;;  %v3513_v2 = vld [vmem:[%s3780_s30 + $0x1d0] sm:$0xff]  ;;  %v3512_v6 = vld [vmem:[%s3780_s30 + $0x1c8] sm:$0xff] }
  0x2c   : > { %2159 = vmatpush.bf16.msra.mxu3 %v3482_v20  ;;  %v211_v7 = vld [vmem:[%s3769_s20 + $0x18] sm:$0xff]  ;;  %v210_v8 = vld [vmem:[%s3769_s20 + $0x10] sm:$0xff]  ;;  %v3487_v9 = vld [vmem:[%s3780_s30 + $0x100] sm:$0xff] }
  0x2d   : > { %2121 = vmatpush.bf16.msra.mxu0 %v3457_v21  ;;  %v3495_v10 = vld [vmem:[%s3780_s30 + $0x140] sm:$0xff]  ;;  %v694_v11 = vunpack.c.l.b16 %v211_v7  ;;  %v692_v12 = vunpack.c.l.b16 %v210_v8  ;;  %v695_v15 = vunpack.c.h.b16 %v211_v7  ;;  %v693_v16 = vunpack.c.h.b16 %v210_v8  ;;  %v3526_v17 = vld [vmem:[%s3780_s30 + $0x238] sm:$0xff]  ;;  %v3524_v29 = vld [vmem:[%s3780_s30 + $0x228] sm:$0xff] }
  0x2e   : > { %2134 = vmatpush.bf16.msra.mxu1 %v3465_v22  ;;  %v3503_v13 = vld [vmem:[%s3780_s30 + $0x180] sm:$0xff]  ;;  %v3534_v18 = vld [vmem:[%s3780_s30 + $0x278] sm:$0xff]  ;;  %v3532_v30 = vld [vmem:[%s3780_s30 + $0x268] sm:$0xff] }
  0x2f   : > { %2147 = vmatpush.bf16.msra.mxu2 %v3473_v23  ;;  %v3511_v14 = vld [vmem:[%s3780_s30 + $0x1c0] sm:$0xff]  ;;  %v3542_v19 = vld [vmem:[%s3780_s30 + $0x2b8] sm:$0xff]  ;;  %v722_v21 = vpack.c.b16 %v694_v11, %v694_v11  ;;  %v720_v22 = vpack.c.b16 %v692_v12, %v692_v12  ;;  %v723_v23 = vpack.c.b16 %v695_v15, %v695_v15  ;;  %v3556_v7 = vld [vmem:[%s3780_s30 + $0x328] sm:$0xff] }
  0x30   : > { %2160 = vmatpush.bf16.msra.mxu3 %v3481_v24  ;;  %v3550_v20 = vld [vmem:[%s3780_s30 + $0x2f8] sm:$0xff]  ;;  %v721_v24 = vpack.c.b16 %v693_v16, %v693_v16  ;;  %v3523_v33 = vld [vmem:[%s3780_s30 + $0x220] sm:$0xff]  ;;  %v3564_v8 = vld [vmem:[%s3780_s30 + $0x368] sm:$0xff] }
  0x31   : > { %2122 = vmatpush.bf16.msra.mxu0 %v3456_v25  ;;  %v3525_v25 = vld [vmem:[%s3780_s30 + $0x230] sm:$0xff]  ;;  %v3531_v34 = vld [vmem:[%s3780_s30 + $0x260] sm:$0xff]  ;;  %v3522_v37 = vld [vmem:[%s3780_s30 + $0x218] sm:$0xff] }
  0x32   : > { %2135 = vmatpush.bf16.msra.mxu1 %v3464_v26  ;;  %v3533_v26 = vld [vmem:[%s3780_s30 + $0x270] sm:$0xff]  ;;  %v3530_v38 = vld [vmem:[%s3780_s30 + $0x258] sm:$0xff]  ;;  %v3555_v11 = vld [vmem:[%s3780_s30 + $0x320] sm:$0xff] }
  0x33   : > { %2148 = vmatpush.bf16.msra.mxu2 %v3472_v27  ;;  %v3541_v27 = vld [vmem:[%s3780_s30 + $0x2b0] sm:$0xff]  ;;  %v3563_v12 = vld [vmem:[%s3780_s30 + $0x360] sm:$0xff]  ;;  %v3554_v15 = vld [vmem:[%s3780_s30 + $0x318] sm:$0xff] }
  0x34   : > { %2161 = vmatpush.bf16.msra.mxu3 %v3480_v28  ;;  %v3549_v28 = vld [vmem:[%s3780_s30 + $0x2f0] sm:$0xff]  ;;  %v3562_v16 = vld [vmem:[%s3780_s30 + $0x358] sm:$0xff] }
  0x35   : > { %2123 = vmatpush.bf16.msra.mxu0 %v3455_v31  ;;  %v3540_v31 = vld [vmem:[%s3780_s30 + $0x2a8] sm:$0xff] }
  0x36   : > { %2136 = vmatpush.bf16.msra.mxu1 %v3463_v32  ;;  %v3548_v32 = vld [vmem:[%s3780_s30 + $0x2e8] sm:$0xff] }
  0x37   : > { %2149 = vmatpush.bf16.msra.mxu2 %v3471_v35  ;;  %v3539_v35 = vld [vmem:[%s3780_s30 + $0x2a0] sm:$0xff] }
  0x38   : > { %2162 = vmatpush.bf16.msra.mxu3 %v3479_v36  ;;  %2124 = vmatmul.bf16.vlgmr.msra.gmra.mxu0 %v716_v44  ;;  %v3547_v36 = vld [vmem:[%s3780_s30 + $0x2e0] sm:$0xff]  ;;  %v3545_v44 = vld [vmem:[%s3780_s30 + $0x2d0] sm:$0xff] }
  0x39   : > { %2168 = vmatpush.bf16.msrb.mxu0 %v3494_v39  ;;  %2137 = vmatmul.bf16.vlgmr.msra.gmra.mxu1 %v717_v46  ;;  %v3538_v39 = vld [vmem:[%s3780_s30 + $0x298] sm:$0xff]  ;;  %v3528_v46 = vld [vmem:[%s3780_s30 + $0x248] sm:$0xff] }
  0x3a   : > { %2181 = vmatpush.bf16.msrb.mxu1 %v3502_v40  ;;  %2150 = vmatmul.bf16.vlgmr.msra.gmra.mxu2 %v718_v43  ;;  %v3546_v40 = vld [vmem:[%s3780_s30 + $0x2d8] sm:$0xff]  ;;  %v3537_v43 = vld [vmem:[%s3780_s30 + $0x290] sm:$0xff] }
  0x3b   : > { %2194 = vmatpush.bf16.msrb.mxu2 %v3510_v41  ;;  %2163 = vmatmul.bf16.vlgmr.msra.gmra.mxu3 %v719_v45  ;;  %v3521_v41 = vld [vmem:[%s3780_s30 + $0x210] sm:$0xff]  ;;  %v3520_v45 = vld [vmem:[%s3780_s30 + $0x208] sm:$0xff] }
  0x3c   : > { %2207 = vmatpush.bf16.msrb.mxu3 %v3518_v42  ;;  %v3529_v42 = vld [vmem:[%s3780_s30 + $0x250] sm:$0xff] }
  0x3d   : > { %2169 = vmatpush.bf16.msrb.mxu0 %v3493_v47  ;;  %v3536_v47 = vld [vmem:[%s3780_s30 + $0x288] sm:$0xff] }
  0x3e   : > { %2182 = vmatpush.bf16.msrb.mxu1 %v3501_v48  ;;  %v3544_v48 = vld [vmem:[%s3780_s30 + $0x2c8] sm:$0xff] }
  0x3f   : > { %2195 = vmatpush.bf16.msrb.mxu2 %v3509_v49  ;;  %v212_v49 = vld [vmem:[%s3769_s20 + $0x20] sm:$0xff] }
  0x40   : > { %2208 = vmatpush.bf16.msrb.mxu3 %v3517_v50  ;;  %v213_v50 = vld [vmem:[%s3769_s20 + $0x28] sm:$0xff] }
  0x41   : > { %2170 = vmatpush.bf16.msrb.mxu0 %v3492_v51  ;;  %v3519_v51 = vld [vmem:[%s3780_s30 + $0x200] sm:$0xff] }
  0x42   : > { %2183 = vmatpush.bf16.msrb.mxu1 %v3500_v52  ;;  %v3527_v52 = vld [vmem:[%s3780_s30 + $0x240] sm:$0xff] }
  0x43   : > { %2196 = vmatpush.bf16.msrb.mxu2 %v3508_v53  ;;  %v696_v53 = vunpack.c.l.b16 %v212_v49 }
  0x44   : > { %2209 = vmatpush.bf16.msrb.mxu3 %v3516_v54  ;;  %v698_v54 = vunpack.c.l.b16 %v213_v50 }
  0x45   : > { %2171 = vmatpush.bf16.msrb.mxu0 %v3491_v55  ;;  %v3535_v55 = vld [vmem:[%s3780_s30 + $0x280] sm:$0xff] }
  0x46   : > { %2184 = vmatpush.bf16.msrb.mxu1 %v3499_v56  ;;  %v3543_v56 = vld [vmem:[%s3780_s30 + $0x2c0] sm:$0xff] }
  0x47   : > { %2197 = vmatpush.bf16.msrb.mxu2 %v3507_v57  ;;  %v697_v57 = vunpack.c.h.b16 %v212_v49  ;;  %v3588_v49 = vld [vmem:[%s3780_s30 + $0x428] sm:$0xff] }
  0x48   : > { %2210 = vmatpush.bf16.msrb.mxu3 %v3515_v58  ;;  %v699_v58 = vunpack.c.h.b16 %v213_v50  ;;  %v3596_v50 = vld [vmem:[%s3780_s30 + $0x468] sm:$0xff] }
  0x49   : > { %2172 = vmatpush.bf16.msrb.mxu0 %v3490_v59  ;;  %v3558_v59 = vld [vmem:[%s3780_s30 + $0x338] sm:$0xff] }
  0x4a   : > { %2185 = vmatpush.bf16.msrb.mxu1 %v3498_v60  ;;  %v3566_v60 = vld [vmem:[%s3780_s30 + $0x378] sm:$0xff] }
  0x4b   : > { %2198 = vmatpush.bf16.msrb.mxu2 %v3506_v61  ;;  %v3574_v61 = vld [vmem:[%s3780_s30 + $0x3b8] sm:$0xff] }
  0x4c   : > { %2211 = vmatpush.bf16.msrb.mxu3 %v3514_v62  ;;  %v3582_v62 = vld [vmem:[%s3780_s30 + $0x3f8] sm:$0xff] }
  0x4d   : > { %2173 = vmatpush.bf16.msrb.mxu0 %v3489_v63  ;;  %v724_v63 = vpack.c.b16 %v696_v53, %v696_v53  ;;  %v3587_v53 = vld [vmem:[%s3780_s30 + $0x420] sm:$0xff] }
  0x4e   : > { %2186 = vmatpush.bf16.msrb.mxu1 %v3497_v0  ;;  %v726_v0 = vpack.c.b16 %v698_v54, %v698_v54  ;;  %v3595_v54 = vld [vmem:[%s3780_s30 + $0x460] sm:$0xff] }
  0x4f   : > { %2199 = vmatpush.bf16.msrb.mxu2 %v3505_v1  ;;  %v725_v1 = vpack.c.b16 %v697_v57, %v697_v57  ;;  %v3586_v57 = vld [vmem:[%s3780_s30 + $0x418] sm:$0xff] }
  0x50   : > { %2212 = vmatpush.bf16.msrb.mxu3 %v3513_v2  ;;  %v727_v2 = vpack.c.b16 %v699_v58, %v699_v58  ;;  %v3594_v58 = vld [vmem:[%s3780_s30 + $0x458] sm:$0xff] }
  0x51   : > { %2174 = vmatpush.bf16.msrb.mxu0 %v3488_v3  ;;  %v3557_v3 = vld [vmem:[%s3780_s30 + $0x330] sm:$0xff] }
  0x52   : > { %2187 = vmatpush.bf16.msrb.mxu1 %v3496_v4  ;;  %v3565_v4 = vld [vmem:[%s3780_s30 + $0x370] sm:$0xff] }
  0x53   : > { %2200 = vmatpush.bf16.msrb.mxu2 %v3504_v5  ;;  %v3573_v5 = vld [vmem:[%s3780_s30 + $0x3b0] sm:$0xff] }
  0x54   : > { %2213 = vmatpush.bf16.msrb.mxu3 %v3512_v6  ;;  %v3581_v6 = vld [vmem:[%s3780_s30 + $0x3f0] sm:$0xff] }
  0x55   : > { %2175 = vmatpush.bf16.msrb.mxu0 %v3487_v9  ;;  %v3572_v9 = vld [vmem:[%s3780_s30 + $0x3a8] sm:$0xff] }
  0x56   : > { %2188 = vmatpush.bf16.msrb.mxu1 %v3495_v10  ;;  %v3580_v10 = vld [vmem:[%s3780_s30 + $0x3e8] sm:$0xff] }
  0x57   : > { %2201 = vmatpush.bf16.msrb.mxu2 %v3503_v13  ;;  %v3571_v13 = vld [vmem:[%s3780_s30 + $0x3a0] sm:$0xff] }
  0x58   : > { %2214 = vmatpush.bf16.msrb.mxu3 %v3511_v14  ;;  %2176 = vmatmul.bf16.vlgmr.msrb.gmra.mxu0 %v720_v22  ;;  %v3579_v14 = vld [vmem:[%s3780_s30 + $0x3e0] sm:$0xff]  ;;  %v3577_v22 = vld [vmem:[%s3780_s30 + $0x3d0] sm:$0xff] }
  0x59   : > { %2220 = vmatpush.bf16.msra.mxu0 %v3526_v17  ;;  %2189 = vmatmul.bf16.vlgmr.msrb.gmra.mxu1 %v721_v24  ;;  %v3570_v17 = vld [vmem:[%s3780_s30 + $0x398] sm:$0xff]  ;;  %v3560_v24 = vld [vmem:[%s3780_s30 + $0x348] sm:$0xff] }
  0x5a   : > { %2233 = vmatpush.bf16.msra.mxu1 %v3534_v18  ;;  %2202 = vmatmul.bf16.vlgmr.msrb.gmra.mxu2 %v722_v21  ;;  %v3578_v18 = vld [vmem:[%s3780_s30 + $0x3d8] sm:$0xff]  ;;  %v3569_v21 = vld [vmem:[%s3780_s30 + $0x390] sm:$0xff] }
  0x5b   : > { %2246 = vmatpush.bf16.msra.mxu2 %v3542_v19  ;;  %2215 = vmatmul.bf16.vlgmr.msrb.gmra.mxu3 %v723_v23  ;;  %v3553_v19 = vld [vmem:[%s3780_s30 + $0x310] sm:$0xff]  ;;  %v3552_v23 = vld [vmem:[%s3780_s30 + $0x308] sm:$0xff] }
  0x5c   : > { %2259 = vmatpush.bf16.msra.mxu3 %v3550_v20  ;;  %v3561_v20 = vld [vmem:[%s3780_s30 + $0x350] sm:$0xff] }
  0x5d   : > { %2221 = vmatpush.bf16.msra.mxu0 %v3525_v25  ;;  %v3568_v25 = vld [vmem:[%s3780_s30 + $0x388] sm:$0xff] }
  0x5e   : > { %2234 = vmatpush.bf16.msra.mxu1 %v3533_v26  ;;  %v3576_v26 = vld [vmem:[%s3780_s30 + $0x3c8] sm:$0xff] }
  0x5f   : > { %2247 = vmatpush.bf16.msra.mxu2 %v3541_v27  ;;  %v214_v27 = vld [vmem:[%s3769_s20 + $0x30] sm:$0xff] }
  0x60   : > { %2260 = vmatpush.bf16.msra.mxu3 %v3549_v28  ;;  %v215_v28 = vld [vmem:[%s3769_s20 + $0x38] sm:$0xff] }
  0x61   : > { %2222 = vmatpush.bf16.msra.mxu0 %v3524_v29  ;;  %v3551_v29 = vld [vmem:[%s3780_s30 + $0x300] sm:$0xff] }
  0x62   : > { %2235 = vmatpush.bf16.msra.mxu1 %v3532_v30  ;;  %v3559_v30 = vld [vmem:[%s3780_s30 + $0x340] sm:$0xff] }
  0x63   : > { %2248 = vmatpush.bf16.msra.mxu2 %v3540_v31  ;;  %v700_v31 = vunpack.c.l.b16 %v214_v27 }
  0x64   : > { %2261 = vmatpush.bf16.msra.mxu3 %v3548_v32  ;;  %v702_v32 = vunpack.c.l.b16 %v215_v28 }
  0x65   : > { %2223 = vmatpush.bf16.msra.mxu0 %v3523_v33  ;;  %v3567_v33 = vld [vmem:[%s3780_s30 + $0x380] sm:$0xff] }
  0x66   : > { %2236 = vmatpush.bf16.msra.mxu1 %v3531_v34  ;;  %v3575_v34 = vld [vmem:[%s3780_s30 + $0x3c0] sm:$0xff] }
  0x67   : > { %2249 = vmatpush.bf16.msra.mxu2 %v3539_v35  ;;  %v701_v35 = vunpack.c.h.b16 %v214_v27  ;;  %v3620_v27 = vld [vmem:[%s3780_s30 + $0x528] sm:$0xff] }
  0x68   : > { %2262 = vmatpush.bf16.msra.mxu3 %v3547_v36  ;;  %v703_v36 = vunpack.c.h.b16 %v215_v28  ;;  %v3628_v28 = vld [vmem:[%s3780_s30 + $0x568] sm:$0xff] }
  0x69   : > { %2224 = vmatpush.bf16.msra.mxu0 %v3522_v37  ;;  %v3590_v37 = vld [vmem:[%s3780_s30 + $0x438] sm:$0xff] }
  0x6a   : > { %2237 = vmatpush.bf16.msra.mxu1 %v3530_v38  ;;  %v3598_v38 = vld [vmem:[%s3780_s30 + $0x478] sm:$0xff] }
  0x6b   : > { %2250 = vmatpush.bf16.msra.mxu2 %v3538_v39  ;;  %v3606_v39 = vld [vmem:[%s3780_s30 + $0x4b8] sm:$0xff] }
  0x6c   : > { %2263 = vmatpush.bf16.msra.mxu3 %v3546_v40  ;;  %v3614_v40 = vld [vmem:[%s3780_s30 + $0x4f8] sm:$0xff] }
  0x6d   : > { %2225 = vmatpush.bf16.msra.mxu0 %v3521_v41  ;;  %v728_v41 = vpack.c.b16 %v700_v31, %v700_v31 }
  0x6e   : > { %2238 = vmatpush.bf16.msra.mxu1 %v3529_v42  ;;  %v730_v42 = vpack.c.b16 %v702_v32, %v702_v32  ;;  %v3619_v32 = vld [vmem:[%s3780_s30 + $0x520] sm:$0xff] }
  0x6f   : > { %2251 = vmatpush.bf16.msra.mxu2 %v3537_v43  ;;  %v729_v43 = vpack.c.b16 %v701_v35, %v701_v35  ;;  %v3635_v35 = vld [vmem:[%s3780_s30 + $0x5a0] sm:$0xff] }
  0x70   : > { %2264 = vmatpush.bf16.msra.mxu3 %v3545_v44  ;;  %v731_v44 = vpack.c.b16 %v703_v36, %v703_v36  ;;  %v3643_v36 = vld [vmem:[%s3780_s30 + $0x5e0] sm:$0xff] }
  0x71   : > { %2226 = vmatpush.bf16.msra.mxu0 %v3520_v45  ;;  %v3589_v45 = vld [vmem:[%s3780_s30 + $0x430] sm:$0xff] }
  0x72   : > { %2239 = vmatpush.bf16.msra.mxu1 %v3528_v46  ;;  %v3597_v46 = vld [vmem:[%s3780_s30 + $0x470] sm:$0xff] }
  0x73   : > { %2252 = vmatpush.bf16.msra.mxu2 %v3536_v47  ;;  %v3605_v47 = vld [vmem:[%s3780_s30 + $0x4b0] sm:$0xff] }
  0x74   : > { %2265 = vmatpush.bf16.msra.mxu3 %v3544_v48  ;;  %v3613_v48 = vld [vmem:[%s3780_s30 + $0x4f0] sm:$0xff] }
  0x75   : > { %2227 = vmatpush.bf16.msra.mxu0 %v3519_v51  ;;  %v3604_v51 = vld [vmem:[%s3780_s30 + $0x4a8] sm:$0xff] }
  0x76   : > { %2240 = vmatpush.bf16.msra.mxu1 %v3527_v52  ;;  %v3612_v52 = vld [vmem:[%s3780_s30 + $0x4e8] sm:$0xff] }
  0x77   : > { %2253 = vmatpush.bf16.msra.mxu2 %v3535_v55  ;;  %v3603_v55 = vld [vmem:[%s3780_s30 + $0x4a0] sm:$0xff] }
  0x78   : > { %2266 = vmatpush.bf16.msra.mxu3 %v3543_v56  ;;  %2228 = vmatmul.bf16.vlgmr.msra.gmra.mxu0 %v724_v63  ;;  %v3611_v56 = vld [vmem:[%s3780_s30 + $0x4e0] sm:$0xff]  ;;  %v3601_v63 = vld [vmem:[%s3780_s30 + $0x490] sm:$0xff] }
  0x79   : > { %2272 = vmatpush.bf16.msrb.mxu0 %v3558_v59  ;;  %2241 = vmatmul.bf16.vlgmr.msra.gmra.mxu1 %v725_v1  ;;  %v3602_v59 = vld [vmem:[%s3780_s30 + $0x498] sm:$0xff]  ;;  %v3584_v1 = vld [vmem:[%s3780_s30 + $0x408] sm:$0xff] }
  0x7a   : > { %2285 = vmatpush.bf16.msrb.mxu1 %v3566_v60  ;;  %2254 = vmatmul.bf16.vlgmr.msra.gmra.mxu2 %v726_v0  ;;  %v3610_v60 = vld [vmem:[%s3780_s30 + $0x4d8] sm:$0xff]  ;;  %v3609_v0 = vld [vmem:[%s3780_s30 + $0x4d0] sm:$0xff] }
  0x7b   : > { %2298 = vmatpush.bf16.msrb.mxu2 %v3574_v61  ;;  %2267 = vmatmul.bf16.vlgmr.msra.gmra.mxu3 %v727_v2  ;;  %v3585_v61 = vld [vmem:[%s3780_s30 + $0x410] sm:$0xff]  ;;  %v3592_v2 = vld [vmem:[%s3780_s30 + $0x448] sm:$0xff] }
  0x7c   : > { %2311 = vmatpush.bf16.msrb.mxu3 %v3582_v62  ;;  %v3593_v62 = vld [vmem:[%s3780_s30 + $0x450] sm:$0xff] }
  0x7d   : > { %2273 = vmatpush.bf16.msrb.mxu0 %v3557_v3  ;;  %v3600_v3 = vld [vmem:[%s3780_s30 + $0x488] sm:$0xff] }
  0x7e   : > { %2286 = vmatpush.bf16.msrb.mxu1 %v3565_v4  ;;  %v3608_v4 = vld [vmem:[%s3780_s30 + $0x4c8] sm:$0xff] }
  0x7f   : > { %2299 = vmatpush.bf16.msrb.mxu2 %v3573_v5  ;;  %v216_v5 = vld [vmem:[%s3769_s20 + $0x40] sm:$0xff] }
  0x80   : > { %2312 = vmatpush.bf16.msrb.mxu3 %v3581_v6  ;;  %v217_v6 = vld [vmem:[%s3769_s20 + $0x48] sm:$0xff] }
  0x81   : > { %2274 = vmatpush.bf16.msrb.mxu0 %v3556_v7  ;;  %v3583_v7 = vld [vmem:[%s3780_s30 + $0x400] sm:$0xff] }
  0x82   : > { %2287 = vmatpush.bf16.msrb.mxu1 %v3564_v8  ;;  %v3591_v8 = vld [vmem:[%s3780_s30 + $0x440] sm:$0xff] }
  0x83   : > { %2300 = vmatpush.bf16.msrb.mxu2 %v3572_v9  ;;  %v704_v9 = vunpack.c.l.b16 %v216_v5 }
  0x84   : > { %2313 = vmatpush.bf16.msrb.mxu3 %v3580_v10  ;;  %v706_v10 = vunpack.c.l.b16 %v217_v6 }
  0x85   : > { %2275 = vmatpush.bf16.msrb.mxu0 %v3555_v11  ;;  %v3599_v11 = vld [vmem:[%s3780_s30 + $0x480] sm:$0xff] }
  0x86   : > { %2288 = vmatpush.bf16.msrb.mxu1 %v3563_v12  ;;  %v3607_v12 = vld [vmem:[%s3780_s30 + $0x4c0] sm:$0xff] }
  0x87   : > { %2301 = vmatpush.bf16.msrb.mxu2 %v3571_v13  ;;  %v705_v13 = vunpack.c.h.b16 %v216_v5  ;;  %v3662_v5 = vld [vmem:[%s3780_s30 + $0x678] sm:$0xff] }
  0x88   : > { %2314 = vmatpush.bf16.msrb.mxu3 %v3579_v14  ;;  %v707_v14 = vunpack.c.h.b16 %v217_v6  ;;  %v3670_v6 = vld [vmem:[%s3780_s30 + $0x6b8] sm:$0xff] }
  0x89   : > { %2276 = vmatpush.bf16.msrb.mxu0 %v3554_v15  ;;  %v3622_v15 = vld [vmem:[%s3780_s30 + $0x538] sm:$0xff] }
  0x8a   : > { %2289 = vmatpush.bf16.msrb.mxu1 %v3562_v16  ;;  %v3630_v16 = vld [vmem:[%s3780_s30 + $0x578] sm:$0xff] }
  0x8b   : > { %2302 = vmatpush.bf16.msrb.mxu2 %v3570_v17  ;;  %v3638_v17 = vld [vmem:[%s3780_s30 + $0x5b8] sm:$0xff] }
  0x8c   : > { %2315 = vmatpush.bf16.msrb.mxu3 %v3578_v18  ;;  %v3646_v18 = vld [vmem:[%s3780_s30 + $0x5f8] sm:$0xff] }
  0x8d   : > { %2277 = vmatpush.bf16.msrb.mxu0 %v3553_v19  ;;  %v732_v19 = vpack.c.b16 %v704_v9, %v704_v9 }
  0x8e   : > { %2290 = vmatpush.bf16.msrb.mxu1 %v3561_v20  ;;  %v734_v20 = vpack.c.b16 %v706_v10, %v706_v10 }
  0x8f   : > { %2303 = vmatpush.bf16.msrb.mxu2 %v3569_v21  ;;  %v733_v21 = vpack.c.b16 %v705_v13, %v705_v13  ;;  %v3661_v13 = vld [vmem:[%s3780_s30 + $0x670] sm:$0xff] }
  0x90   : > { %2316 = vmatpush.bf16.msrb.mxu3 %v3577_v22  ;;  %v735_v22 = vpack.c.b16 %v707_v14, %v707_v14  ;;  %v3669_v14 = vld [vmem:[%s3780_s30 + $0x6b0] sm:$0xff] }
  0x91   : > { %2278 = vmatpush.bf16.msrb.mxu0 %v3552_v23  ;;  %v3621_v23 = vld [vmem:[%s3780_s30 + $0x530] sm:$0xff] }
  0x92   : > { %2291 = vmatpush.bf16.msrb.mxu1 %v3560_v24  ;;  %v3629_v24 = vld [vmem:[%s3780_s30 + $0x570] sm:$0xff] }
  0x93   : > { %2304 = vmatpush.bf16.msrb.mxu2 %v3568_v25  ;;  %v3637_v25 = vld [vmem:[%s3780_s30 + $0x5b0] sm:$0xff] }
  0x94   : > { %2317 = vmatpush.bf16.msrb.mxu3 %v3576_v26  ;;  %v3645_v26 = vld [vmem:[%s3780_s30 + $0x5f0] sm:$0xff] }
  0x95   : > { %2279 = vmatpush.bf16.msrb.mxu0 %v3551_v29  ;;  %v3636_v29 = vld [vmem:[%s3780_s30 + $0x5a8] sm:$0xff] }
  0x96   : > { %2292 = vmatpush.bf16.msrb.mxu1 %v3559_v30  ;;  %v3644_v30 = vld [vmem:[%s3780_s30 + $0x5e8] sm:$0xff] }
  0x97   : > { %2305 = vmatpush.bf16.msrb.mxu2 %v3567_v33  ;;  %v3627_v33 = vld [vmem:[%s3780_s30 + $0x560] sm:$0xff] }
  0x98   : > { %2318 = vmatpush.bf16.msrb.mxu3 %v3575_v34  ;;  %2280 = vmatmul.bf16.vlgmr.msrb.gmra.mxu0 %v728_v41  ;;  %v3642_v41 = vld [vmem:[%s3780_s30 + $0x5d8] sm:$0xff] }
  0x99   : > { %2324 = vmatpush.bf16.msra.mxu0 %v3590_v37  ;;  %2293 = vmatmul.bf16.vlgmr.msrb.gmra.mxu1 %v729_v43 }
  0x9a   : > { %2337 = vmatpush.bf16.msra.mxu1 %v3598_v38  ;;  %2306 = vmatmul.bf16.vlgmr.msrb.gmra.mxu2 %v730_v42  ;;  %v3618_v38 = vld [vmem:[%s3780_s30 + $0x518] sm:$0xff] }
  0x9b   : > { %2350 = vmatpush.bf16.msra.mxu2 %v3606_v39  ;;  %2319 = vmatmul.bf16.vlgmr.msrb.gmra.mxu3 %v731_v44  ;;  %v3626_v39 = vld [vmem:[%s3780_s30 + $0x558] sm:$0xff] }
  0x9c   : > { %2363 = vmatpush.bf16.msra.mxu3 %v3614_v40  ;;  %v3634_v40 = vld [vmem:[%s3780_s30 + $0x598] sm:$0xff] }
  0x9d   : > { %2325 = vmatpush.bf16.msra.mxu0 %v3589_v45 }
  0x9e   : > { %2338 = vmatpush.bf16.msra.mxu1 %v3597_v46  ;;  %v3617_v46 = vld [vmem:[%s3780_s30 + $0x510] sm:$0xff] }
  0x9f   : > { %2351 = vmatpush.bf16.msra.mxu2 %v3605_v47  ;;  %v3625_v47 = vld [vmem:[%s3780_s30 + $0x550] sm:$0xff] }
  0xa0   : > { %2364 = vmatpush.bf16.msra.mxu3 %v3613_v48 }
  0xa1   : > { %2326 = vmatpush.bf16.msra.mxu0 %v3588_v49 }
  0xa2   : > { %2339 = vmatpush.bf16.msra.mxu1 %v3596_v50  ;;  %v3633_v50 = vld [vmem:[%s3780_s30 + $0x590] sm:$0xff] }
  0xa3   : > { %2352 = vmatpush.bf16.msra.mxu2 %v3604_v51  ;;  %v3641_v51 = vld [vmem:[%s3780_s30 + $0x5d0] sm:$0xff] }
  0xa4   : > { %2365 = vmatpush.bf16.msra.mxu3 %v3612_v52  ;;  %v3616_v52 = vld [vmem:[%s3780_s30 + $0x508] sm:$0xff] }
  0xa5   : > { %2327 = vmatpush.bf16.msra.mxu0 %v3587_v53  ;;  %v3624_v53 = vld [vmem:[%s3780_s30 + $0x548] sm:$0xff] }
  0xa6   : > { %2340 = vmatpush.bf16.msra.mxu1 %v3595_v54  ;;  %v3632_v54 = vld [vmem:[%s3780_s30 + $0x588] sm:$0xff] }
  0xa7   : > { %2353 = vmatpush.bf16.msra.mxu2 %v3603_v55  ;;  %v3640_v55 = vld [vmem:[%s3780_s30 + $0x5c8] sm:$0xff] }
  0xa8   : > { %2366 = vmatpush.bf16.msra.mxu3 %v3611_v56  ;;  %v218_v56 = vld [vmem:[%s3769_s20 + $0x50] sm:$0xff] }
  0xa9   : > { %2328 = vmatpush.bf16.msra.mxu0 %v3586_v57  ;;  %v219_v57 = vld [vmem:[%s3769_s20 + $0x58] sm:$0xff] }
  0xaa   : > { %2341 = vmatpush.bf16.msra.mxu1 %v3594_v58 }
  0xab   : > { %2354 = vmatpush.bf16.msra.mxu2 %v3602_v59 }
  0xac   : > { %2367 = vmatpush.bf16.msra.mxu3 %v3610_v60  ;;  %v3615_v60 = vld [vmem:[%s3780_s30 + $0x500] sm:$0xff] }
  0xad   : > { %2329 = vmatpush.bf16.msra.mxu0 %v3585_v61  ;;  %v3623_v61 = vld [vmem:[%s3780_s30 + $0x540] sm:$0xff] }
  0xae   : > { %2342 = vmatpush.bf16.msra.mxu1 %v3593_v62  ;;  %v708_v62 = vunpack.c.l.b16 %v218_v56 }
  0xaf   : > { %2355 = vmatpush.bf16.msra.mxu2 %v3601_v63  ;;  %v710_v63 = vunpack.c.l.b16 %v219_v57 }
  0xb0   : > { %2368 = vmatpush.bf16.msra.mxu3 %v3609_v0  ;;  %v3631_v0 = vld [vmem:[%s3780_s30 + $0x580] sm:$0xff] }
  0xb1   : > { %2330 = vmatpush.bf16.msra.mxu0 %v3584_v1  ;;  %v3639_v1 = vld [vmem:[%s3780_s30 + $0x5c0] sm:$0xff]  ;;  %v738_v9 = vpack.c.b16 %v710_v63, %v710_v63 }
  0xb2   : > { %2343 = vmatpush.bf16.msra.mxu1 %v3592_v2  ;;  %v709_v2 = vunpack.c.h.b16 %v218_v56  ;;  %v3663_v56 = vld [vmem:[%s3780_s30 + $0x680] sm:$0xff] }
  0xb3   : > { %2356 = vmatpush.bf16.msra.mxu2 %v3600_v3  ;;  %v711_v3 = vunpack.c.h.b16 %v219_v57  ;;  %v3671_v57 = vld [vmem:[%s3780_s30 + $0x6c0] sm:$0xff] }
  0xb4   : > { %2369 = vmatpush.bf16.msra.mxu3 %v3608_v4  ;;  %v3654_v4 = vld [vmem:[%s3780_s30 + $0x638] sm:$0xff]  ;;  %v737_v10 = vpack.c.b16 %v709_v2, %v709_v2 }
  0xb5   : > { %2331 = vmatpush.bf16.msra.mxu0 %v3583_v7  ;;  %v2125_v31 = vpop.f32.mrf.mxu0  ;;  %v3678_v7 = vld [vmem:[%s3780_s30 + $0x6f8] sm:$0xff] }
  0xb6   : > { %2344 = vmatpush.bf16.msra.mxu1 %v3591_v8  ;;  %v2138_v34 = vpop.f32.mrf.mxu1  ;;  %v736_v8 = vpack.c.b16 %v708_v62, %v708_v62 }
  0xb7   : > { %2357 = vmatpush.bf16.msra.mxu2 %v3599_v11  ;;  %v2139_v37 = vadd.f32 %v2138_v34, %v2125_v31  ;;  %v739_v11 = vpack.c.b16 %v711_v3, %v711_v3  ;;  %v3674_v31 = vld [vmem:[%s3780_s30 + $0x6d8] sm:$0xff] }
  0xb8   : > { %2370 = vmatpush.bf16.msra.mxu3 %v3607_v12  ;;  %2332 = vmatmul.bf16.vlgmr.msra.gmra.mxu0 %v732_v19  ;;  %v3653_v12 = vld [vmem:[%s3780_s30 + $0x630] sm:$0xff]  ;;  %v3676_v19 = vld [vmem:[%s3780_s30 + $0x6e8] sm:$0xff] }
  0xb9   : > { %2376 = vmatpush.bf16.msrb.mxu0 %v3622_v15  ;;  %2345 = vmatmul.bf16.vlgmr.msra.gmra.mxu1 %v733_v21  ;;  %v3677_v15 = vld [vmem:[%s3780_s30 + $0x6f0] sm:$0xff]  ;;  %v3651_v21 = vld [vmem:[%s3780_s30 + $0x620] sm:$0xff] }
  0xba   : > { %2389 = vmatpush.bf16.msrb.mxu1 %v3630_v16  ;;  %2358 = vmatmul.bf16.vlgmr.msra.gmra.mxu2 %v734_v20  ;;  %v3652_v16 = vld [vmem:[%s3780_s30 + $0x628] sm:$0xff] }
  0xbb   : > { %2402 = vmatpush.bf16.msrb.mxu2 %v3638_v17  ;;  %2371 = vmatmul.bf16.vlgmr.msra.gmra.mxu3 %v735_v22  ;;  %v3660_v17 = vld [vmem:[%s3780_s30 + $0x668] sm:$0xff]  ;;  %v3659_v22 = vld [vmem:[%s3780_s30 + $0x660] sm:$0xff] }
  0xbc   : > { %2415 = vmatpush.bf16.msrb.mxu3 %v3646_v18  ;;  %v3668_v18 = vld [vmem:[%s3780_s30 + $0x6a8] sm:$0xff] }
  0xbd   : > { %2377 = vmatpush.bf16.msrb.mxu0 %v3621_v23  ;;  %v2151_v42 = vpop.f32.mrf.mxu2  ;;  %v2127_v45 = vpop.f32.mrf.mxu0 }
  0xbe   : > { %2390 = vmatpush.bf16.msrb.mxu1 %v3629_v24  ;;  %v2152_v43 = vadd.f32 %v2151_v42, %v2139_v37  ;;  %v2164_v44 = vpop.f32.mrf.mxu3  ;;  %v2140_v49 = vpop.f32.mrf.mxu1  ;;  %v3657_v37 = vld [vmem:[%s3780_s30 + $0x650] sm:$0xff]  ;;  %v3648_v42 = vld [vmem:[%s3780_s30 + $0x608] sm:$0xff] }
  0xbf   : > { %2403 = vmatpush.bf16.msrb.mxu2 %v3637_v25  ;;  %v3667_v25 = vld [vmem:[%s3780_s30 + $0x6a0] sm:$0xff]  ;;  %v3664_v45 = vld [vmem:[%s3780_s30 + $0x688] sm:$0xff] }
  0xc0   : > { %2416 = vmatpush.bf16.msrb.mxu3 %v3645_v26  ;;  %v3974_v48 = vadd.f32 %v2164_v44, %v2152_v43  ;;  %v3675_v26 = vld [vmem:[%s3780_s30 + $0x6e0] sm:$0xff]  ;;  %v3656_v43 = vld [vmem:[%s3780_s30 + $0x648] sm:$0xff] }
  0xc1   : > { %2378 = vmatpush.bf16.msrb.mxu0 %v3620_v27  ;;  %v220_v44 = vld [vmem:[%s3769_s20 + $0x60] sm:$0xff] }
  0xc2   : > { %2391 = vmatpush.bf16.msrb.mxu1 %v3628_v28  ;;  %v3650_v28 = vld [vmem:[%s3780_s30 + $0x618] sm:$0xff] }
  0xc3   : > { %2404 = vmatpush.bf16.msrb.mxu2 %v3636_v29  ;;  %v3658_v29 = vld [vmem:[%s3780_s30 + $0x658] sm:$0xff] }
  0xc4   : > { %2417 = vmatpush.bf16.msrb.mxu3 %v3644_v30  ;;  %v3666_v30 = vld [vmem:[%s3780_s30 + $0x698] sm:$0xff] }
  0xc5   : > { %2379 = vmatpush.bf16.msrb.mxu0 %v3619_v32  ;;  %v2153_v58 = vpop.f32.mrf.mxu2 }
  0xc6   : > { %2392 = vmatpush.bf16.msrb.mxu1 %v3627_v33  ;;  %v2166_v59 = vpop.f32.mrf.mxu3 }
  0xc7   : > { %2405 = vmatpush.bf16.msrb.mxu2 %v3635_v35 }
  0xc8   : > { %2418 = vmatpush.bf16.msrb.mxu3 %v3643_v36  ;;  %v3649_v36 = vld [vmem:[%s3780_s30 + $0x610] sm:$0xff] }
  0xc9   : > { %2380 = vmatpush.bf16.msrb.mxu0 %v3618_v38 }
  0xca   : > { %2393 = vmatpush.bf16.msrb.mxu1 %v3626_v39 }
  0xcb   : > { %2406 = vmatpush.bf16.msrb.mxu2 %v3634_v40  ;;  %v3665_v40 = vld [vmem:[%s3780_s30 + $0x690] sm:$0xff] }
  0xcc   : > { %2419 = vmatpush.bf16.msrb.mxu3 %v3642_v41  ;;  %v3673_v41 = vld [vmem:[%s3780_s30 + $0x6d0] sm:$0xff] }
  0xcd   : > { %2381 = vmatpush.bf16.msrb.mxu0 %v3617_v46  ;;  %v3672_v46 = vld [vmem:[%s3780_s30 + $0x6c8] sm:$0xff] }
  0xce   : > { %2394 = vmatpush.bf16.msrb.mxu1 %v3625_v47  ;;  %v221_v47 = vld [vmem:[%s3769_s20 + $0x68] sm:$0xff] }
  0xcf   : > { %2407 = vmatpush.bf16.msrb.mxu2 %v3633_v50  ;;  %v712_v50 = vunpack.c.l.b16 %v220_v44 }
  0xd0   : > { %2420 = vmatpush.bf16.msrb.mxu3 %v3641_v51  ;;  %v713_v51 = vunpack.c.h.b16 %v220_v44 }
  0xd1   : > { %2382 = vmatpush.bf16.msrb.mxu0 %v3616_v52  ;;  %v3647_v52 = vld [vmem:[%s3780_s30 + $0x600] sm:$0xff]  ;;  %v740_v58 = vpack.c.b16 %v712_v50, %v712_v50 }
  0xd2   : > { %2395 = vmatpush.bf16.msrb.mxu1 %v3624_v53  ;;  %v3655_v53 = vld [vmem:[%s3780_s30 + $0x640] sm:$0xff]  ;;  %v741_v59 = vpack.c.b16 %v713_v51, %v713_v51 }
  0xd3   : > { %2408 = vmatpush.bf16.msrb.mxu2 %v3632_v54  ;;  %v714_v54 = vunpack.c.l.b16 %v221_v47 }
  0xd4   : > { %2421 = vmatpush.bf16.msrb.mxu3 %v3640_v55  ;;  %v715_v55 = vunpack.c.h.b16 %v221_v47 }
  0xd5   : > { %2383 = vmatpush.bf16.msrb.mxu0 %v3615_v60  ;;  %v2177_v20 = vpop.f32.mrf.mxu0  ;;  %v742_v60 = vpack.c.b16 %v714_v54, %v714_v54 }
  0xd6   : > { %2396 = vmatpush.bf16.msrb.mxu1 %v3623_v61  ;;  %v2178_v23 = vadd.f32 %v2177_v20, %v3974_v48  ;;  %v2190_v24 = vpop.f32.mrf.mxu1  ;;  %v743_v61 = vpack.c.b16 %v715_v55, %v715_v55  ;;  %v207_v55 = vld [vmem:[%s4041_s3] sm:$0xff] }
  0xd7   : > { %2409 = vmatpush.bf16.msrb.mxu2 %v3631_v0 }
  0xd8   : > { %2422 = vmatpush.bf16.msrb.mxu3 %v3639_v1  ;;  %2384 = vmatmul.bf16.vlgmr.msrb.gmra.mxu0 %v736_v8  ;;  %v2191_v27 = vadd.f32 %v2190_v24, %v2178_v23 }
  0xd9   : > { %2428 = vmatpush.bf16.msra.mxu0 %v3654_v4  ;;  %2397 = vmatmul.bf16.vlgmr.msrb.gmra.mxu1 %v737_v10 }
  0xda   : > { %2441 = vmatpush.bf16.msra.mxu1 %v3662_v5  ;;  %2410 = vmatmul.bf16.vlgmr.msrb.gmra.mxu2 %v738_v9 }
  0xdb   : > { %2454 = vmatpush.bf16.msra.mxu2 %v3670_v6  ;;  %2423 = vmatmul.bf16.vlgmr.msrb.gmra.mxu3 %v739_v11 }
  0xdc   : > { %2467 = vmatpush.bf16.msra.mxu3 %v3678_v7 }
  0xdd   : > { %2429 = vmatpush.bf16.msra.mxu0 %v3653_v12  ;;  %v2203_v32 = vpop.f32.mrf.mxu2  ;;  %v2179_v35 = vpop.f32.mrf.mxu0 }
  0xde   : > { %2442 = vmatpush.bf16.msra.mxu1 %v3661_v13  ;;  %v2204_v33 = vadd.f32 %v2203_v32, %v2191_v27  ;;  %v2216_v34 = vpop.f32.mrf.mxu3  ;;  %v2192_v39 = vpop.f32.mrf.mxu1 }
  0xdf   : > { %2455 = vmatpush.bf16.msra.mxu2 %v3669_v14 }
  0xe0   : > { %2468 = vmatpush.bf16.msra.mxu3 %v3677_v15  ;;  %v2217_v38 = vadd.f32 %v2216_v34, %v2204_v33 }
  0xe1   : > { %2430 = vmatpush.bf16.msra.mxu0 %v3652_v16 }
  0xe2   : > { %2443 = vmatpush.bf16.msra.mxu1 %v3660_v17 }
  0xe3   : > { %2456 = vmatpush.bf16.msra.mxu2 %v3668_v18 }
  0xe4   : > { %2469 = vmatpush.bf16.msra.mxu3 %v3676_v19 }
  0xe5   : > { %2431 = vmatpush.bf16.msra.mxu0 %v3651_v21  ;;  %v2205_v48 = vpop.f32.mrf.mxu2 }
  0xe6   : > { %2444 = vmatpush.bf16.msra.mxu1 %v3659_v22  ;;  %v2218_v49 = vpop.f32.mrf.mxu3 }
  0xe7   : > { %2457 = vmatpush.bf16.msra.mxu2 %v3667_v25 }
  0xe8   : > { %2470 = vmatpush.bf16.msra.mxu3 %v3675_v26 }
  0xe9   : > { %2432 = vmatpush.bf16.msra.mxu0 %v3650_v28 }
  0xea   : > { %2445 = vmatpush.bf16.msra.mxu1 %v3658_v29 }
  0xeb   : > { %2458 = vmatpush.bf16.msra.mxu2 %v3666_v30 }
  0xec   : > { %2471 = vmatpush.bf16.msra.mxu3 %v3674_v31 }
  0xed   : > { %2433 = vmatpush.bf16.msra.mxu0 %v3649_v36 }
  0xee   : > { %2446 = vmatpush.bf16.msra.mxu1 %v3657_v37 }
  0xef   : > { %2459 = vmatpush.bf16.msra.mxu2 %v3665_v40 }
  0xf0   : > { %2472 = vmatpush.bf16.msra.mxu3 %v3673_v41 }
  0xf1   : > { %2434 = vmatpush.bf16.msra.mxu0 %v3648_v42 }
  0xf2   : > { %2447 = vmatpush.bf16.msra.mxu1 %v3656_v43 }
  0xf3   : > { %2460 = vmatpush.bf16.msra.mxu2 %v3664_v45 }
  0xf4   : > { %2473 = vmatpush.bf16.msra.mxu3 %v3672_v46 }
  0xf5   : > { %2435 = vmatpush.bf16.msra.mxu0 %v3647_v52  ;;  %v2229_v62 = vpop.f32.mrf.mxu0 }
  0xf6   : > { %2448 = vmatpush.bf16.msra.mxu1 %v3655_v53  ;;  %v2230_v63 = vadd.f32 %v2229_v62, %v2217_v38  ;;  %v2242_v0 = vpop.f32.mrf.mxu1 }
  0xf7   : > { %2461 = vmatpush.bf16.msra.mxu2 %v3663_v56 }
  0xf8   : > { %2474 = vmatpush.bf16.msra.mxu3 %v3671_v57  ;;  %2436 = vmatmul.bf16.vlgmr.msra.gmra.mxu0 %v740_v58  ;;  %v2243_v1 = vadd.f32 %v2242_v0, %v2230_v63 }
  0xf9   : > { %2449 = vmatmul.bf16.vlgmr.msra.gmra.mxu1 %v741_v59 }
  0xfa   : > { %2462 = vmatmul.bf16.vlgmr.msra.gmra.mxu2 %v742_v60 }
  0xfb   : > { %2475 = vmatmul.bf16.vlgmr.msra.gmra.mxu3 %v743_v61 }
  0xfd   : > { %v2255_v2 = vpop.f32.mrf.mxu2  ;;  %v2231_v5 = vpop.f32.mrf.mxu0 }
  0xfe   : > { %v2256_v3 = vadd.f32 %v2255_v2, %v2243_v1  ;;  %v2268_v4 = vpop.f32.mrf.mxu3  ;;  %v2244_v7 = vpop.f32.mrf.mxu1 }
 0x100   : > { %v2269_v6 = vadd.f32 %v2268_v4, %v2256_v3 }
 0x105   : > { %v2257_v8 = vpop.f32.mrf.mxu2 }
 0x106   : > { %v2270_v9 = vpop.f32.mrf.mxu3 }
 0x115   : > { %v2281_v10 = vpop.f32.mrf.mxu0 }
 0x116   : > { %v2282_v11 = vadd.f32 %v2281_v10, %v2269_v6  ;;  %v2294_v12 = vpop.f32.mrf.mxu1 }
 0x118   : > { %v2295_v13 = vadd.f32 %v2294_v12, %v2282_v11 }
 0x11d   : > { %v2307_v14 = vpop.f32.mrf.mxu2  ;;  %v2283_v17 = vpop.f32.mrf.mxu0 }
 0x11e   : > { %v2308_v15 = vadd.f32 %v2307_v14, %v2295_v13  ;;  %v2320_v16 = vpop.f32.mrf.mxu3  ;;  %v2296_v19 = vpop.f32.mrf.mxu1 }
 0x120   : > { %v2321_v18 = vadd.f32 %v2320_v16, %v2308_v15 }
 0x125   : > { %v2309_v20 = vpop.f32.mrf.mxu2 }
 0x126   : > { %v2322_v21 = vpop.f32.mrf.mxu3 }
 0x135   : > { %v2333_v22 = vpop.f32.mrf.mxu0 }
 0x136   : > { %v2346_v23 = vpop.f32.mrf.mxu1  ;;  %v2334_v33 = vadd.f32 %v2333_v22, %v2321_v18 }
 0x138   : > { %v2347_v37 = vadd.f32 %v2346_v23, %v2334_v33 }
 0x13d   : > { %v2359_v24 = vpop.f32.mrf.mxu2  ;;  %v2335_v26 = vpop.f32.mrf.mxu0 }
 0x13e   : > { %v2372_v25 = vpop.f32.mrf.mxu3  ;;  %v2348_v27 = vpop.f32.mrf.mxu1  ;;  %v2360_v38 = vadd.f32 %v2359_v24, %v2347_v37 }
 0x140   : > { %v2373_v41 = vadd.f32 %v2372_v25, %v2360_v38 }
 0x145   : > { %v2361_v28 = vpop.f32.mrf.mxu2 }
 0x146   : > { %v2374_v29 = vpop.f32.mrf.mxu3 }
 0x155   : > { %v2385_v30 = vpop.f32.mrf.mxu0 }
 0x156   : > { %v2398_v31 = vpop.f32.mrf.mxu1  ;;  %v2386_v42 = vadd.f32 %v2385_v30, %v2373_v41 }
 0x158   : > { %v2399_v43 = vadd.f32 %v2398_v31, %v2386_v42 }
 0x15d   : > { %v2411_v32 = vpop.f32.mrf.mxu2  ;;  %v2387_v35 = vpop.f32.mrf.mxu0 }
 0x15e   : > { %v2424_v34 = vpop.f32.mrf.mxu3  ;;  %v2400_v36 = vpop.f32.mrf.mxu1  ;;  %v2412_v44 = vadd.f32 %v2411_v32, %v2399_v43 }
 0x160   : > { %v2425_v45 = vadd.f32 %v2424_v34, %v2412_v44 }
 0x165   : > { %v2413_v39 = vpop.f32.mrf.mxu2 }
 0x166   : > { %v2426_v40 = vpop.f32.mrf.mxu3 }
 0x175   : > { %v2437_v46 = vpop.f32.mrf.mxu0 }
 0x176   : > { %v2450_v47 = vpop.f32.mrf.mxu1  ;;  %v2438_v48 = vadd.f32 %v2437_v46, %v2425_v45 }
 0x178   : > { %v2451_v49 = vadd.f32 %v2450_v47, %v2438_v48 }
 0x17d   : > { %v2463_v50 = vpop.f32.mrf.mxu2  ;;  %v2439_v53 = vpop.f32.mrf.mxu0 }
 0x17e   : > { %v2476_v51 = vpop.f32.mrf.mxu3  ;;  %v2464_v52 = vadd.f32 %v2463_v50, %v2451_v49  ;;  %v2452_v54 = vpop.f32.mrf.mxu1 }
 0x180   : > { %v2477_v56 = vadd.f32 %v2476_v51, %v2464_v52 }
 0x182   : > { %v2480_v57 = vadd.f32 %v2477_v56, %v207_v55 }
 0x184   : > { %2481 = vst [vmem:[%s4041_s3] sm:$0xff] %v2480_v57 }
 0x185   : > { %v2465_v58 = vpop.f32.mrf.mxu2 }
 0x186   : > { %v2478_v59 = vpop.f32.mrf.mxu3 }
 0x187 PF: > { %s13_s14 = sadd.s32 1, %s3726_s14   ;;  %s4042_s12 = smov %s3722_s13 }
 0x188   : > { %p10_p6 = scmp.ge.s32.totalorder %s13_s14, 9   ;;  %s4043_s13 = smov %s4045_s15 }
 0x18a   :  { %12 = sbr.rel (!%p10_p6) target bundleno = 2 (0x2), region = 67 }

</bundles_post_ra>
